<compile_context>
chip_gen: v6e
topology: v6e:2x2x1
jax: 0.10.0
libtpu: 0.0.40
codegen_flags: <defaults>
</compile_context>

<pallas_src>
import math
import functools

import jax
import jax.numpy as jnp
from jax.experimental import pallas as pl
from jax.experimental.pallas import tpu as pltpu


def _round_up(n, m):
    return ((n + m - 1) // m) * m


# ----------------------------------------------------------------------------
# Shared cell math (values in, values out) — used by both kernels.
# ----------------------------------------------------------------------------
def _gru_cell(x, h, w1, b1, wi, bgi, wh, bhn, w2, b2):
    """One fc1 -> GRU step -> fc2 pass.

    x: (B, IN) f32, h: (B, H) f32.  Weights may be bf16 (f32 accumulation);
    biases and elementwise math are f32.  Gate columns of wi/wh are laid out
    as three lane-aligned blocks of width G = wi.shape[-1]//3, with the real
    gate occupying the first H lanes of each block.
    """
    f32 = jnp.float32
    wd = w1.dtype
    H = h.shape[-1]
    G = wi.shape[-1] // 3

    # fc1
    xe = jnp.dot(x.astype(wd), w1, preferred_element_type=f32) + b1          # (B, H)

    # GRU: two fused (K, 3*G) matmuls, gates [r|z|n].
    gi = jnp.dot(xe.astype(wd), wi, preferred_element_type=f32) + bgi        # (B, 3G)
    gh = jnp.dot(h.astype(wd), wh, preferred_element_type=f32)               # (B, 3G)

    # Lane-aligned slices (starts are multiples of 128).
    r = jax.nn.sigmoid(gi[:, 0:H] + gh[:, 0:H])
    z = jax.nn.sigmoid(gi[:, G:G + H] + gh[:, G:G + H])
    n = jnp.tanh(gi[:, 2 * G:2 * G + H] + r * (gh[:, 2 * G:2 * G + H] + bhn))
    h_new = n + z * (h - n)                                                  # (B, H)

    # fc2
    y = jnp.dot(h_new.astype(wd), w2, preferred_element_type=f32) + b2       # (B, IN)
    return y, h_new


# ----------------------------------------------------------------------------
# Kernels
# ----------------------------------------------------------------------------
def _encoder_step_kernel(x_ref, h_ref, w1_ref, b1_ref, wi_ref, bgi_ref,
                         wh_ref, bhn_ref, w2_ref, b2_ref, y_ref, hout_ref):
    y, h_new = _gru_cell(x_ref[...], h_ref[...],
                         w1_ref[...], b1_ref[...],
                         wi_ref[...], bgi_ref[...],
                         wh_ref[...], bhn_ref[...],
                         w2_ref[...], b2_ref[...])
    y_ref[...] = y.astype(y_ref.dtype)
    hout_ref[...] = h_new.astype(hout_ref.dtype)


def _encoder_seq_kernel(x_ref, h0_ref, w1_ref, b1_ref, wi_ref, bgi_ref,
                        wh_ref, bhn_ref, w2_ref, b2_ref,
                        y_ref, hout_ref, h_scr):
    t = pl.program_id(0)

    @pl.when(t == 0)
    def _():
        h_scr[...] = h0_ref[...]

    y, h_new = _gru_cell(x_ref[0], h_scr[...],
                         w1_ref[...], b1_ref[...],
                         wi_ref[...], bgi_ref[...],
                         wh_ref[...], bhn_ref[...],
                         w2_ref[...], b2_ref[...])

    y_ref[0] = y.astype(y_ref.dtype)
    h_scr[...] = h_new
    hout_ref[...] = h_new.astype(hout_ref.dtype)   # resident; written back at end


# ----------------------------------------------------------------------------
# Parameter init (PyTorch-style), fusion, wrappers, references
# ----------------------------------------------------------------------------
def init_params(key, input_size, hidden_size):
    """Mimics PyTorch uniform(-1/sqrt(fan_in), 1/sqrt(fan_in)) init.
    Weights are stored pre-transposed so y = x @ W + b."""
    ks = jax.random.split(key, 8)
    H, IN = hidden_size, input_size

    def u(k, shape, bound):
        return jax.random.uniform(k, shape, jnp.float32, -bound, bound)

    b_fc1 = 1.0 / math.sqrt(IN)
    b_gru = 1.0 / math.sqrt(H)
    b_fc2 = 1.0 / math.sqrt(H)

    w1 = u(ks[0], (IN, H), b_fc1)
    b1 = u(ks[1], (1, H), b_fc1)
    w_ih = u(ks[2], (3 * H, H), b_gru)   # [r, z, n] stacked, PyTorch layout
    w_hh = u(ks[3], (3 * H, H), b_gru)
    b_ih = u(ks[4], (3 * H,), b_gru)
    b_hh = u(ks[5], (3 * H,), b_gru)
    w2 = u(ks[6], (H, IN), b_fc2)
    b2 = u(ks[7], (1, IN), b_fc2)

    return {
        "w1": w1, "b1": b1,
        "wir": w_ih[0:H].T, "wiz": w_ih[H:2 * H].T, "win": w_ih[2 * H:3 * H].T,
        "whr": w_hh[0:H].T, "whz": w_hh[H:2 * H].T, "whn": w_hh[2 * H:3 * H].T,
        "bir": b_ih[0:H].reshape(1, H), "biz": b_ih[H:2 * H].reshape(1, H),
        "bin": b_ih[2 * H:3 * H].reshape(1, H),
        "bhr": b_hh[0:H].reshape(1, H), "bhz": b_hh[H:2 * H].reshape(1, H),
        "bhn": b_hh[2 * H:3 * H].reshape(1, H),
        "w2": w2, "b2": b2,
    }


def prepare_params(params, *, hidden_size, weights_dtype=jnp.bfloat16):
    """Fuse the GRU gate matrices column-wise into (H, 3*G) with each gate in
    its own 128-lane-aligned block (G = round_up(H,128)); contraction dims are
    left unpadded.  r/z biases of ih and hh are pre-summed; b_hh[n] stays
    separate (needed inside r*(...)).  Weights default to bf16 for the MXU,
    biases stay f32.  Done once outside the hot path."""
    H = hidden_size
    G = max(_round_up(H, 128), 128)

    def pad_cols(a, cols):
        out = jnp.zeros((a.shape[0], cols), jnp.float32)
        return out.at[:, :a.shape[1]].set(a)

    wi = jnp.concatenate([pad_cols(params["wir"], G),
                          pad_cols(params["wiz"], G),
                          pad_cols(params["win"], G)], axis=1)      # (H, 3G)
    wh = jnp.concatenate([pad_cols(params["whr"], G),
                          pad_cols(params["whz"], G),
                          pad_cols(params["whn"], G)], axis=1)      # (H, 3G)
    bgi = jnp.concatenate([pad_cols(params["bir"] + params["bhr"], G),
                           pad_cols(params["biz"] + params["bhz"], G),
                           pad_cols(params["bin"], G)], axis=1)     # (1, 3G)

    wd = weights_dtype
    return {
        "w1": params["w1"].astype(wd), "b1": params["b1"],
        "wi": wi.astype(wd), "bgi": bgi,
        "wh": wh.astype(wd), "bhn": params["bhn"],
        "w2": params["w2"].astype(wd), "b2": params["b2"],
    }


def encoder_rnn_forward(x, h, fused, *, d_dim, x_dim, y_dim):
    """Single step (matches the PyTorch module's forward).
    x: (B, d_dim, x_dim, y_dim) f32, h: (1, B, H) f32 -> (y, h_new)."""
    B = x.shape[0]
    IN = d_dim * x_dim * y_dim
    H = h.shape[-1]

    x_flat = x.reshape(B, IN)
    h2 = h.reshape(B, H)

    vmem = pl.BlockSpec(memory_space=pltpu.MemorySpace.VMEM)
    inputs = (x_flat, h2,
              fused["w1"], fused["b1"], fused["wi"], fused["bgi"],
              fused["wh"], fused["bhn"], fused["w2"], fused["b2"])

    y, h_new = pl.pallas_call(
        _encoder_step_kernel,
        out_shape=(jax.ShapeDtypeStruct((B, IN), jnp.float32),
                   jax.ShapeDtypeStruct((B, H), jnp.float32)),
        in_specs=[vmem] * len(inputs),
        out_specs=(vmem, vmem),
        input_output_aliases={1: 1},   # h_new reuses h's buffer
    )(*inputs)

    return y.reshape(B, d_dim, x_dim, y_dim), h_new.reshape(1, B, H)


def encoder_rnn_forward_seq(xs, h0, fused, *, d_dim, x_dim, y_dim):
    """Sequence path: the timestep loop runs inside the kernel.
    xs: (T, B, d_dim, x_dim, y_dim) f32, h0: (1, B, H) f32.
    Weights are DMA'd into VMEM once (constant index_maps) and stay resident;
    x_t / y_t are streamed per step; h is carried in a VMEM scratch."""
    T, B = xs.shape[0], xs.shape[1]
    IN = d_dim * x_dim * y_dim
    H = h0.shape[-1]

    x_flat = xs.reshape(T, B, IN)
    h0_2d = h0.reshape(B, H)

    const2d = lambda shape: pl.BlockSpec(shape, lambda t: (0, 0))
    in_specs = [
        pl.BlockSpec((1, B, IN), lambda t: (t, 0, 0)),   # x_t streamed
        const2d((B, H)),                                  # h0
        const2d(fused["w1"].shape), const2d(fused["b1"].shape),
        const2d(fused["wi"].shape), const2d(fused["bgi"].shape),
        const2d(fused["wh"].shape), const2d(fused["bhn"].shape),
        const2d(fused["w2"].shape), const2d(fused["b2"].shape),
    ]
    out_specs = (pl.BlockSpec((1, B, IN), lambda t: (t, 0, 0)),
                 pl.BlockSpec((B, H), lambda t: (0, 0)))

    ys, h_new = pl.pallas_call(
        _encoder_seq_kernel,
        out_shape=(jax.ShapeDtypeStruct((T, B, IN), jnp.float32),
                   jax.ShapeDtypeStruct((B, H), jnp.float32)),
        grid_spec=pltpu.PrefetchScalarGridSpec(
            num_scalar_prefetch=0,
            grid=(T,),
            in_specs=in_specs,
            out_specs=out_specs,
            scratch_shapes=[pltpu.VMEM((B, H), jnp.float32)]),
        compiler_params=pltpu.CompilerParams(
            dimension_semantics=("arbitrary",)),   # sequential recurrence
    )(x_flat, h0_2d,
      fused["w1"], fused["b1"], fused["wi"], fused["bgi"],
      fused["wh"], fused["bhn"], fused["w2"], fused["b2"])

    return ys.reshape(T, B, d_dim, x_dim, y_dim), h_new.reshape(1, B, H)


def reference_forward(x, h, params, *, d_dim, x_dim, y_dim,
                      matmul_dtype=jnp.float32):
    """Pure-JAX reference of the original math.  matmul_dtype=bf16 mirrors the
    kernel's cast-to-bf16 / accumulate-in-f32 matmul path."""
    B = x.shape[0]
    IN = d_dim * x_dim * y_dim
    H = h.shape[-1]
    md = matmul_dtype

    def mm(a, w):
        return jnp.dot(a.astype(md), w.astype(md),
                       preferred_element_type=jnp.float32)

    xf = x.reshape(B, IN).astype(jnp.float32)
    hh = h.reshape(B, H)
    xe = mm(xf, params["w1"]) + params["b1"]
    r = jax.nn.sigmoid(mm(xe, params["wir"]) + params["bir"]
                       + mm(hh, params["whr"]) + params["bhr"])
    z = jax.nn.sigmoid(mm(xe, params["wiz"]) + params["biz"]
                       + mm(hh, params["whz"]) + params["bhz"])
    n = jnp.tanh(mm(xe, params["win"]) + params["bin"]
                 + r * (mm(hh, params["whn"]) + params["bhn"]))
    h_new = (1.0 - z) * n + z * hh
    y = mm(h_new, params["w2"]) + params["b2"]
    return y.reshape(B, d_dim, x_dim, y_dim), h_new.reshape(1, B, H)


if __name__ == "__main__":
    batch_size, d_dim, x_dim, y_dim = 2, 4, 4, 4
    hidden_size = 32
    seq_len = 8
    input_size = d_dim * x_dim * y_dim  # 64
    n_layers = 1

    key = jax.random.PRNGKey(0)
    k_x, k_xs, k_p = jax.random.split(key, 3)

    x = jax.random.normal(k_x, (batch_size, d_dim, x_dim, y_dim), jnp.float32)
    xs = jax.random.normal(k_xs, (seq_len, batch_size, d_dim, x_dim, y_dim), jnp.float32)
    h0 = jnp.zeros((n_layers, batch_size, hidden_size), jnp.float32)  # initHidden()

    params = init_params(k_p, input_size, hidden_size)
    fused = prepare_params(params, hidden_size=hidden_size,
                           weights_dtype=jnp.bfloat16)  # bf16 weights, f32 accumulate

    # --- single-step path (the module's forward) ---
    fwd = jax.jit(functools.partial(encoder_rnn_forward,
                                    d_dim=d_dim, x_dim=x_dim, y_dim=y_dim))
    y, h_new = fwd(x, h0, fused)
    y = jax.block_until_ready(y)
    h_new = jax.block_until_ready(h_new)

    y_m, h_m = reference_forward(x, h0, params, d_dim=d_dim, x_dim=x_dim,
                                 y_dim=y_dim, matmul_dtype=jnp.bfloat16)
    y_f, h_f = reference_forward(x, h0, params, d_dim=d_dim, x_dim=x_dim,
                                 y_dim=y_dim, matmul_dtype=jnp.float32)

    assert y.shape == (batch_size, d_dim, x_dim, y_dim)
    assert h_new.shape == (n_layers, batch_size, hidden_size)
    assert jnp.allclose(y, y_m, atol=2e-3, rtol=2e-3)
    assert jnp.allclose(h_new, h_m, atol=2e-3, rtol=2e-3)
    assert jnp.allclose(y, y_f, atol=3e-2, rtol=3e-2)   # bf16-weight vs pure-f32 math
    assert jnp.allclose(h_new, h_f, atol=3e-2, rtol=3e-2)

    # --- sequence path (timestep loop inside the kernel) ---
    fwd_seq = jax.jit(functools.partial(encoder_rnn_forward_seq,
                                        d_dim=d_dim, x_dim=x_dim, y_dim=y_dim))
    ys, h_seq = fwd_seq(xs, h0, fused)
    ys = jax.block_until_ready(ys)
    h_seq = jax.block_until_ready(h_seq)

    h_r = h0
    ys_ref = []
    for t in range(seq_len):
        y_t, h_r = reference_forward(xs[t], h_r, params, d_dim=d_dim, x_dim=x_dim,
                                     y_dim=y_dim, matmul_dtype=jnp.bfloat16)
        ys_ref.append(y_t)
    ys_ref = jnp.stack(ys_ref)

    assert ys.shape == (seq_len, batch_size, d_dim, x_dim, y_dim)
    assert h_seq.shape == (n_layers, batch_size, hidden_size)
    assert jnp.allclose(ys, ys_ref, atol=5e-3, rtol=5e-3)
    assert jnp.allclose(h_seq, h_r, atol=5e-3, rtol=5e-3)

    print("KERNEL_OK")
</pallas_src>

<mosaic_0001>
module attributes {stable_mosaic.version = 11 : i64} {
  func.func @_encoder_step_kernel(%arg0: memref<2x64xf32, #tpu.memory_space<vmem>>, %arg1: memref<2x32xf32, #tpu.memory_space<vmem>>, %arg2: memref<64x32xbf16, #tpu.memory_space<vmem>>, %arg3: memref<1x32xf32, #tpu.memory_space<vmem>>, %arg4: memref<32x384xbf16, #tpu.memory_space<vmem>>, %arg5: memref<1x384xf32, #tpu.memory_space<vmem>>, %arg6: memref<32x384xbf16, #tpu.memory_space<vmem>>, %arg7: memref<1x32xf32, #tpu.memory_space<vmem>>, %arg8: memref<32x64xbf16, #tpu.memory_space<vmem>>, %arg9: memref<1x64xf32, #tpu.memory_space<vmem>>, %arg10: memref<2x64xf32, #tpu.memory_space<vmem>>, %arg11: memref<2x32xf32, #tpu.memory_space<vmem>>) attributes {dimension_semantics = [], scalar_prefetch = 0 : i64, scratch_operands = 0 : i64, tpu.core_type = #tpu.core_type<tc>} {
    %c0 = arith.constant 0 : index
    %c0_0 = arith.constant 0 : index
    %0 = vector.load %arg0[%c0, %c0_0] : memref<2x64xf32, #tpu.memory_space<vmem>>, vector<2x64xf32>
    %c0_1 = arith.constant 0 : index
    %c0_2 = arith.constant 0 : index
    %1 = vector.load %arg1[%c0_1, %c0_2] : memref<2x32xf32, #tpu.memory_space<vmem>>, vector<2x32xf32>
    %c0_3 = arith.constant 0 : index
    %c0_4 = arith.constant 0 : index
    %2 = vector.load %arg2[%c0_3, %c0_4] : memref<64x32xbf16, #tpu.memory_space<vmem>>, vector<64x32xbf16>
    %c0_5 = arith.constant 0 : index
    %c0_6 = arith.constant 0 : index
    %3 = vector.load %arg3[%c0_5, %c0_6] : memref<1x32xf32, #tpu.memory_space<vmem>>, vector<1x32xf32>
    %c0_7 = arith.constant 0 : index
    %c0_8 = arith.constant 0 : index
    %4 = vector.load %arg4[%c0_7, %c0_8] : memref<32x384xbf16, #tpu.memory_space<vmem>>, vector<32x384xbf16>
    %c0_9 = arith.constant 0 : index
    %c0_10 = arith.constant 0 : index
    %5 = vector.load %arg5[%c0_9, %c0_10] : memref<1x384xf32, #tpu.memory_space<vmem>>, vector<1x384xf32>
    %c0_11 = arith.constant 0 : index
    %c0_12 = arith.constant 0 : index
    %6 = vector.load %arg6[%c0_11, %c0_12] : memref<32x384xbf16, #tpu.memory_space<vmem>>, vector<32x384xbf16>
    %c0_13 = arith.constant 0 : index
    %c0_14 = arith.constant 0 : index
    %7 = vector.load %arg7[%c0_13, %c0_14] : memref<1x32xf32, #tpu.memory_space<vmem>>, vector<1x32xf32>
    %c0_15 = arith.constant 0 : index
    %c0_16 = arith.constant 0 : index
    %8 = vector.load %arg8[%c0_15, %c0_16] : memref<32x64xbf16, #tpu.memory_space<vmem>>, vector<32x64xbf16>
    %c0_17 = arith.constant 0 : index
    %c0_18 = arith.constant 0 : index
    %9 = vector.load %arg9[%c0_17, %c0_18] : memref<1x64xf32, #tpu.memory_space<vmem>>, vector<1x64xf32>
    %10 = arith.truncf %0 : vector<2x64xf32> to vector<2x64xbf16>
    %cst = arith.constant dense<0.000000e+00> : vector<2x32xf32>
    %11 = tpu.matmul %10, %2, %cst {dimension_numbers = #tpu.dot_dimension_numbers<[1], [0], [0], [1], [0, 0, 1, 1], [], []>} : vector<2x64xbf16>, vector<64x32xbf16>, vector<2x32xf32> -> vector<2x32xf32>
    %12 = vector.broadcast %3 : vector<1x32xf32> to vector<2x32xf32>
    %13 = arith.addf %11, %12 : vector<2x32xf32>
    %14 = arith.truncf %13 : vector<2x32xf32> to vector<2x32xbf16>
    %cst_19 = arith.constant dense<0.000000e+00> : vector<2x384xf32>
    %15 = tpu.matmul %14, %4, %cst_19 {dimension_numbers = #tpu.dot_dimension_numbers<[1], [0], [0], [1], [0, 0, 1, 1], [], []>} : vector<2x32xbf16>, vector<32x384xbf16>, vector<2x384xf32> -> vector<2x384xf32>
    %16 = vector.broadcast %5 : vector<1x384xf32> to vector<2x384xf32>
    %17 = arith.addf %15, %16 : vector<2x384xf32>
    %18 = arith.truncf %1 : vector<2x32xf32> to vector<2x32xbf16>
    %cst_20 = arith.constant dense<0.000000e+00> : vector<2x384xf32>
    %19 = tpu.matmul %18, %6, %cst_20 {dimension_numbers = #tpu.dot_dimension_numbers<[1], [0], [0], [1], [0, 0, 1, 1], [], []>} : vector<2x32xbf16>, vector<32x384xbf16>, vector<2x384xf32> -> vector<2x384xf32>
    %20 = vector.extract_strided_slice %17 {offsets = [0, 0], sizes = [2, 32], strides = [1, 1]} : vector<2x384xf32> to vector<2x32xf32>
    %21 = vector.extract_strided_slice %19 {offsets = [0, 0], sizes = [2, 32], strides = [1, 1]} : vector<2x384xf32> to vector<2x32xf32>
    %22 = arith.addf %20, %21 : vector<2x32xf32>
    %23 = arith.negf %22 : vector<2x32xf32>
    %24 = math.exp %23 : vector<2x32xf32>
    %cst_21 = arith.constant 1.000000e+00 : f32
    %25 = vector.broadcast %cst_21 : f32 to vector<2x32xf32>
    %26 = arith.addf %25, %24 : vector<2x32xf32>
    %27 = arith.divf %25, %26 : vector<2x32xf32>
    %28 = vector.extract_strided_slice %17 {offsets = [0, 128], sizes = [2, 32], strides = [1, 1]} : vector<2x384xf32> to vector<2x32xf32>
    %29 = vector.extract_strided_slice %19 {offsets = [0, 128], sizes = [2, 32], strides = [1, 1]} : vector<2x384xf32> to vector<2x32xf32>
    %30 = arith.addf %28, %29 : vector<2x32xf32>
    %31 = arith.negf %30 : vector<2x32xf32>
    %32 = math.exp %31 : vector<2x32xf32>
    %cst_22 = arith.constant 1.000000e+00 : f32
    %33 = vector.broadcast %cst_22 : f32 to vector<2x32xf32>
    %34 = arith.addf %33, %32 : vector<2x32xf32>
    %35 = arith.divf %33, %34 : vector<2x32xf32>
    %36 = vector.extract_strided_slice %17 {offsets = [0, 256], sizes = [2, 32], strides = [1, 1]} : vector<2x384xf32> to vector<2x32xf32>
    %37 = vector.extract_strided_slice %19 {offsets = [0, 256], sizes = [2, 32], strides = [1, 1]} : vector<2x384xf32> to vector<2x32xf32>
    %38 = vector.broadcast %7 : vector<1x32xf32> to vector<2x32xf32>
    %39 = arith.addf %37, %38 : vector<2x32xf32>
    %40 = arith.mulf %27, %39 : vector<2x32xf32>
    %41 = arith.addf %36, %40 : vector<2x32xf32>
    %42 = math.tanh %41 : vector<2x32xf32>
    %43 = arith.subf %1, %42 : vector<2x32xf32>
    %44 = arith.mulf %35, %43 : vector<2x32xf32>
    %45 = arith.addf %42, %44 : vector<2x32xf32>
    %46 = arith.truncf %45 : vector<2x32xf32> to vector<2x32xbf16>
    %cst_23 = arith.constant dense<0.000000e+00> : vector<2x64xf32>
    %47 = tpu.matmul %46, %8, %cst_23 {dimension_numbers = #tpu.dot_dimension_numbers<[1], [0], [0], [1], [0, 0, 1, 1], [], []>} : vector<2x32xbf16>, vector<32x64xbf16>, vector<2x64xf32> -> vector<2x64xf32>
    %48 = vector.broadcast %9 : vector<1x64xf32> to vector<2x64xf32>
    %49 = arith.addf %47, %48 : vector<2x64xf32>
    %c0_24 = arith.constant 0 : index
    %c0_25 = arith.constant 0 : index
    %50 = vector.load %arg10[%c0_24, %c0_25] : memref<2x64xf32, #tpu.memory_space<vmem>>, vector<2x64xf32>
    tpu.vector_store %arg10[%c0_24, %c0_25], %49 {strides = array<i32>} : memref<2x64xf32, #tpu.memory_space<vmem>>, vector<2x64xf32>,
    %c0_26 = arith.constant 0 : index
    %c0_27 = arith.constant 0 : index
    %51 = vector.load %arg11[%c0_26, %c0_27] : memref<2x32xf32, #tpu.memory_space<vmem>>, vector<2x32xf32>
    tpu.vector_store %arg11[%c0_26, %c0_27], %45 {strides = array<i32>} : memref<2x32xf32, #tpu.memory_space<vmem>>, vector<2x32xf32>,
    return
  }
}

</mosaic_0001>

<bundles_post_ra>
// kernel: encoder_rnn_forward.1
= control target key start
LH: loop header
LB: loop body
LE: loop exit
PB: predicated region body
PF: predicated region fallthrough
CT: control target
= control target key end

     0   :  { %17 = vsyncpa [#allocation3], 0  ;;  %s653_s17 = smov [#allocation2]   ;;  %s810_s0 = inlined_call_operand.vmem [shape: f32[2,64], index: 0, kind: input, shape index: {}]   ;;  %s811_s1 = inlined_call_operand.vmem [shape: f32[2,32], index: 1, kind: input, shape index: {}, may-alias: {1,11}]   ;;  %s812_s2 = inlined_call_operand.vmem [shape: bf16[64,32], index: 2, kind: input, shape index: {}]   ;;  %s813_s3 = inlined_call_operand.vmem [shape: f32[1,32], index: 3, kind: input, shape index: {}]   ;;  %s814_s4 = inlined_call_operand.vmem [shape: bf16[32,384], index: 4, kind: input, shape index: {}]   ;;  %s815_s5 = inlined_call_operand.vmem [shape: f32[1,384], index: 5, kind: input, shape index: {}]   ;;  %s816_s6 = inlined_call_operand.hbm [shape: bf16[32,384], index: 6, kind: input, shape index: {}]   ;;  %s817_s7 = inlined_call_operand.vmem [shape: f32[1,32], index: 7, kind: input, shape index: {}]   ;;  %s818_s8 = inlined_call_operand.vmem [shape: bf16[32,64], index: 8, kind: input, shape index: {}]   ;;  %s819_s9 = inlined_call_operand.vmem [shape: f32[1,64], index: 9, kind: input, shape index: {}]   ;;  %s820_s10 = inlined_call_operand.vmem [shape: f32[2,64], index: 10, kind: output, shape index: {0}]   ;;  %s821_s11 = inlined_call_operand.vmem [shape: f32[2,32], index: 11, kind: output, shape index: {1}, may-alias: {1,11}]  }
   0x1   :  { %s35_s18 = sshll.u32 %s653_s17, 4  ;;  %s36_s18 = int_to_ptr.vmem [resolvable:$true] %s35_s18 }
   0x2   :  { %s639_s19 = scalar_lea.vmem %s36_s18, 768  ;;  %p644_p1 = scmp.lt.s32.totalorder %s36_s18, %s36_s18 }
   0x3   :  { %p640_p0 = scmp.ne.s32.totalorder %s36_s18, %s639_s19  ;;  %p645_p2 = scmp.lt.s32.totalorder %s639_s19, %s639_s19 }
   0x5   :  { %p646_p3 = por %p645_p2, %p644_p1 }
   0x7   :  { %p647_p4 = pnand %p646_p3, %p640_p0 }
   0x9   :  { %650 = shalt.err (!%p647_p4)
}
   0xa   :  { %s654_s20 = smov 192   ;;  %s655_s21 = smov 12  }
   0xb   :  { %41 = dma.hbm_to_vmem [thread:$0]  %s816_s6, 768, %s36_s18, [#allocation3], %s654_s20, %s654_s20, %s655_s21  }
   0xc   :  { %651 = dma.done.wait [#allocation3], 768  }
   0xd   :  { %652 = vsyncadd [#allocation3], 4294966528  ;;  %v656_v0 = vmov 0.0   ;;  %vm657_vm0 = vmmov 0   ;;  %v599_v1 = vld [vmem:[%s812_s2 + $0x18] sm:$0xff]   ;;  %v600_v2 = vld [vmem:[%s812_s2 + $0x10] sm:$0xff]   ;;  %v163_v35 = vlaneseq }
   0xe   :  { %557 = vmatprep.subr.bf16.mxu0 %v656_v0  ;;  %565 = vmatprep.mubr.msk.bf16.mxu0 %vm657_vm0, %v656_v0  ;;  %v601_v3 = vld [vmem:[%s812_s2 + $0x8] sm:$0xff]   ;;  %v602_v5 = vld [vmem:[%s812_s2] sm:$0xff]   ;;  %vm117_vm1 = vcmask 523264   ;;  %v658_v16 = vmov 0   ;;  %vm210_vm2 = vcmask 261120   ;;  %vm503_vm3 = vcmask 254976  }
   0xf   :  { %558 = vmatpush3.bf16.msra.mxu0 %v599_v1  ;;  %v606_v4 = vld [vmem:[%s814_s4 + $0x1c] ss:$12 sps:$4 sm:$0xff]   ;;  %v52_v6 = vld [vmem:[%s810_s0] sm:$0x3]  ;;  %v611_v7 = vld [vmem:[%s814_s4 + $0x18] ss:$12 sps:$4 sm:$0xff]   ;;  %246 = vmatprep.mubr.bf16.mxu1 %v658_v16 }
  0x10   :  { %559 = vmatprep.subr.bf16.mxu0 %v656_v0  ;;  %226 = vmatprep.subr.bf16.mxu1 %v606_v4  ;;  %v605_v8 = vld [vmem:[#allocation2 + $0x1c] ss:$12 sps:$4 sm:$0xff]   ;;  %v86_v9 = vpack.c.bf16 %v52_v6, %v52_v6  ;;  %v603_v10 = vld [vmem:[#allocation2 + $0x18] ss:$12 sps:$4 sm:$0xff]   ;;  %v608_v12 = vld [vmem:[#allocation2] ss:$12 sps:$4 sm:$0xff]  }
  0x11   :  { %227 = vmatpush1.bf16.msra.mxu1 %v611_v7  ;;  %v610_v11 = vld [vmem:[#allocation2 + $0x4] ss:$12 sps:$4 sm:$0xff]   ;;  %v753_v13 = vld [vmem:[%s811_s1] sm:$0x3]  ;;  %v616_v26 = vld [vmem:[%s814_s4 + $0x8] ss:$12 sps:$4 sm:$0xff]  }
  0x12   :  { %v612_v14 = vld [vmem:[%s814_s4 + $0x4] ss:$12 sps:$4 sm:$0xff]   ;;  %v295_v15 = vpack.c.bf16 %v753_v13, %v753_v13  ;;  %v614_v17 = vld [vmem:[%s814_s4] ss:$12 sps:$4 sm:$0xff]   ;;  %v618_v28 = vld [vmem:[#allocation2 + $0x8] ss:$12 sps:$4 sm:$0xff]  }
  0x13   :  { %560 = vmatpush3.bf16.msra.mxu0 %v600_v2  ;;  %228 = vmatprep.subr.bf16.mxu1 %v612_v14  ;;  %v514_v18 = vld [vmem:[%s813_s3] ss:$0 sm:$0xff]  ;;  %v619_v33 = vld [vmem:[%s818_s8 + $0x8] sm:$0xff]   ;;  %v164_v36 = vshrl.u32 %v163_v35, 7  ;;  %vm501_vm4 = vcmask 517120  }
  0x14   :  { %561 = vmatprep.subr.bf16.mxu0 %v656_v0  ;;  %v615_v22 = vld [vmem:[%s814_s4 + $0x20] ss:$12 sps:$4 sm:$0xff]  }
  0x15   :  { %229 = vmatpush1.bf16.msra.mxu1 %v614_v17  ;;  %v617_v27 = vld [vmem:[#allocation2 + $0x20] ss:$12 sps:$4 sm:$0xff]   ;;  %v165_v37 = vsub.s32 0, %v164_v36  ;;  %v169_v42 = vsub.s32 1, %v164_v36  ;;  %v173_v62 = vsub.s32 2, %v164_v36 }
  0x16   :  { %569 = vmatprep.subr.bf16.mxu1 %v656_v0  ;;  %v620_v34 = vld [vmem:[%s818_s8] sm:$0xff]  }
  0x17   :  { %562 = vmatpush3.bf16.msra.mxu0 %v601_v3  ;;  %v71_v38 = vld [vmem:[%s815_s5] sm:$0x7] }
  0x18   :  { %563 = vmatprep.subr.bf16.mxu0 %v656_v0  ;;  %v166_v39 = vrot.slane %v71_v38, %v165_v37  ;;  %v170_v47 = vrot.slane %v71_v38, %v169_v42  ;;  %v538_v63 = vld [vmem:[%s817_s7] ss:$0 sm:$0xff] }
  0x1b   :  { %564 = vmatpush3.bf16.msra.mxu0 %v602_v5 }
  0x1c   :  { %343 = vmatprep.subr.bf16.mxu0 %v605_v8 }
  0x1e   :  { %566 = vmatmul.mubr.msk.bf16.vlgmr.msra.gmra.mxu0 %vm117_vm1, %v86_v9 }
  0x1f   :  { %344 = vmatpush1.bf16.msra.mxu0 %v603_v10  ;;  %363 = vmatprep.mubr.bf16.mxu0 %v658_v16 }
  0x20   :  { %345 = vmatprep.subr.bf16.mxu0 %v610_v11 }
  0x23   :  { %346 = vmatpush1.bf16.msra.mxu0 %v608_v12 }
  0x24   :  { %585 = vmatprep.subr.bf16.mxu0 %v656_v0 }
  0x26   :  { %534 = vmatmul.mubr.msk.bf16.vlgmr.msra.gmra.mxu0 %vm210_vm2, %v295_v15 }
  0x27   :  { %589 = vmatprep.mubr.msk.bf16.mxu0 %vm657_vm0, %v656_v0  ;;  %586 = vmatpush3.bf16.msra.mxu0 %v619_v33 }
  0x28   :  { %587 = vmatprep.subr.bf16.mxu0 %v656_v0 }
  0x2b   :  { %588 = vmatpush3.bf16.msra.mxu0 %v620_v34 }
  0xde   :  { %v155_v19 = vpop.f32.mrf.mxu0 }
  0xdf   :  { %v156_v20 = vadd.f32 %v514_v18, %v155_v19 }
  0xe0   :  { %v567_v21 = vpop.f32.mrf.mxu0 }
  0xe1   :  { %v161_v23 = vpack.c.bf16 %v156_v20, %v156_v20 }
  0xe2   :  { %v158_v24 = vpop.f32.mrf.mxu0 }
  0xe3   :  { %526 = vmatmul.mubr.msk.bf16.vlgmr.msra.gmra.mxu1 %vm210_vm2, %v161_v23 }
  0xe4   :  { %v568_v25 = vpop.f32.mrf.mxu0  ;;  %570 = vmatpush3.bf16.msra.mxu1 %v615_v22  ;;  %573 = vmatprep.mubr.msk.bf16.mxu1 %vm657_vm0, %v656_v0 }
  0xe5   :  { %571 = vmatprep.subr.bf16.mxu1 %v656_v0 }
  0xe6   :  { %v365_v29 = vpop.f32.mrf.mxu0 }
  0xe8   :  { %572 = vmatpush3.bf16.msra.mxu1 %v616_v26  ;;  %v367_v30 = vpop.f32.mrf.mxu0 }
  0xe9   :  { %577 = vmatprep.subr.bf16.mxu1 %v656_v0 }
  0xea   :  { %v369_v31 = vpop.f32.mrf.mxu0 }
  0xeb   :  { %574 = vmatmul.mubr.msk.bf16.vlgmr.msra.gmra.mxu1 %vm210_vm2, %v161_v23 }
  0xec   :  { %578 = vmatpush3.bf16.msra.mxu1 %v617_v27  ;;  %581 = vmatprep.mubr.msk.bf16.mxu1 %vm657_vm0, %v656_v0  ;;  %v370_v32 = vpop.f32.mrf.mxu0 }
  0xed   :  { %579 = vmatprep.subr.bf16.mxu1 %v656_v0  ;;  %v174_v0 = vrot.slane %v71_v38, %v173_v62 }
  0xf0   :  { %580 = vmatpush3.bf16.msra.mxu1 %v618_v28 }
  0xf3   :  { %582 = vmatmul.mubr.msk.bf16.vlgmr.msra.gmra.mxu1 %vm210_vm2, %v295_v15  ;;  %v539_v15 = vld [vmem:[%s819_s9] ss:$0 sm:$0xff] }
 0x1a3   :  { %v248_v40 = vpop.f32.mrf.mxu1 }
 0x1a4   :  { %v249_v41 = vadd.f32 %v248_v40, %v166_v39 }
 0x1a5   :  { %v250_v43 = vpop.f32.mrf.mxu1 }
 0x1a6   :  { %v412_v44 = vadd.f32 %v365_v29, %v249_v41  ;;  %v251_v50 = vadd.f32 %v250_v43, %v170_v47 }
 0x1a7   :  { %v252_v45 = vpop.f32.mrf.mxu1 }
 0x1a8   :  { %v536_v46 = vmul.f32 -1.442695, %v412_v44  ;;  %v419_v53 = vadd.f32 %v367_v30, %v251_v50 }
 0x1a9   :  { %v253_v48 = vpop.f32.mrf.mxu1 }
 0x1aa   :  { %621 = vpow2.f32 %v536_v46  ;;  %v537_v56 = vmul.f32 -1.442695, %v419_v53 }
 0x1ab   :  { %v289_v49 = vpop.f32.mrf.mxu1 }
 0x1ac   :  { %623 = vpow2.f32 %v537_v56  ;;  %v290_v4 = vadd.f32 %v289_v49, %v174_v0 }
 0x1ad   :  { %v575_v51 = vpop.f32.mrf.mxu1 }
 0x1af   :  { %v292_v52 = vpop.f32.mrf.mxu1 }
 0x1b1   :  { %v576_v54 = vpop.f32.mrf.mxu1 }
 0x1b3   :  { %v406_v55 = vpop.f32.mrf.mxu1 }
 0x1b4   :  { %v432_v1 = vadd.f32 %v538_v63, %v406_v55 }
 0x1b5   :  { %v583_v57 = vpop.f32.mrf.mxu1 }
 0x1b7   :  { %v622_v58 = vpop.eup %621  ;;  %v409_v59 = vpop.f32.mrf.mxu1 }
 0x1b8   :  { %v416_v60 = vadd.f32 1.0, %v622_v58 }
 0x1b9   :  { %v584_v61 = vpop.f32.mrf.mxu1  ;;  %v624_v2 = vpop.eup %623 }
 0x1ba   :  { %625 = vrcp.f32 %v416_v60  ;;  %v423_v6 = vadd.f32 1.0, %v624_v2 }
 0x1c7   :  { %v626_v3 = vpop.eup %625 }
 0x1c8   :  { %v433_v5 = vmul.f32 %v626_v3, %v432_v1 }
 0x1ca   :  { %v434_v7 = vadd.f32 %v433_v5, %v290_v4 }
 0x1cc   :  { %627 = vtanh.f32 %v434_v7 }
 0x1cd   :  { %629 = vrcp.f32 %v423_v6 }
 0x1d9   :  { %v628_v8 = vpop.eup %627 }
 0x1da   :  { %v436_v9 = vsub.f32 %v753_v13, %v628_v8  ;;  %v630_v10 = vpop.eup %629 }
 0x1dc   :  { %v437_v11 = vmul.f32 %v630_v10, %v436_v9 }
 0x1de   :  { %v438_v12 = vadd.f32 %v628_v8, %v437_v11 }
 0x1e0   :  { %v439_v14 = vpack.c.bf16 %v438_v12, %v438_v12  ;;  %504 = vst.msk [vmem:[%s821_s11] sm:$0x3] %vm503_vm3, %v438_v12 }
 0x1e2   :  { %590 = vmatmul.mubr.msk.bf16.vlgmr.msra.gmra.mxu0 %vm210_vm2, %v439_v14 }
 0x2a2   :  { %v495_v16 = vpop.f32.mrf.mxu0 }
 0x2a3   :  { %v496_v17 = vadd.f32 %v539_v15, %v495_v16 }
 0x2a4   :  { %v591_v18 = vpop.f32.mrf.mxu0 }
 0x2a5   :  { %502 = vst.msk [vmem:[%s820_s10] sm:$0x3] %vm501_vm4, %v496_v17 }
 0x2a6   :  { %v498_v13 = vpop.f32.mrf.mxu0 }
 0x2a8   :  { %v592_v19 = vpop.f32.mrf.mxu0 }
 0x2a9   :  { %513 = vsyncpa [#allocation3], 1 }

</bundles_post_ra>
